<compile_context>
chip_gen: v5e
topology: v5e:2x2
jax: 0.10.0
libtpu: 0.0.40
codegen_flags: <defaults>
</compile_context>

<pallas_src>
import functools

import jax
import jax.numpy as jnp
import numpy as np
from jax import lax
from jax.experimental import pallas as pl
from jax.experimental.pallas import tpu as pltpu

EPSILON = 1e-08


def _ced_kernel(logits_ref, tgt_ref,
                inter_ref, totalp_ref, cnt_ref, cenum_ref, *,
                ignore_index: int, hw: int, tile: int):
    """Accumulates per-class dice / CE statistics for one (image, pixel-tile) block.

    Block shapes (classes on sublanes, pixels on lanes):
      logits_ref: (1, C, TILE) f32      tgt_ref: (1, 1, TILE) i32
      inter_ref / totalp_ref / cnt_ref / cenum_ref: (1, C, 1) f32 accumulators
    """
    j = pl.program_id(1)

    @pl.when(j == 0)
    def _():
        inter_ref[...] = jnp.zeros_like(inter_ref)
        totalp_ref[...] = jnp.zeros_like(totalp_ref)
        cnt_ref[...] = jnp.zeros_like(cnt_ref)
        cenum_ref[...] = jnp.zeros_like(cenum_ref)

    x = logits_ref[0].astype(jnp.float32)             # (C, TILE)
    t = tgt_ref[0]                                    # (1, TILE) int32

    # Numerically stable softmax / log-softmax over the (small) class axis.
    m = jnp.max(x, axis=0, keepdims=True)             # (1, TILE)
    ex = jnp.exp(x - m)
    denom = jnp.sum(ex, axis=0, keepdims=True)        # (1, TILE)
    probs = ex / denom                                # (C, TILE)
    neglogp = (m + jnp.log(denom)) - x                # (C, TILE) == -log_softmax(x)

    cls = lax.broadcasted_iota(jnp.int32, x.shape, 0)  # (C, TILE)
    tgt_mask = t != ignore_index                       # (1, TILE)

    if hw % tile != 0:
        # Only the ragged case needs in-kernel tail masking; no `valid` array in HBM.
        col = lax.broadcasted_iota(jnp.int32, (1, tile), 1) + j * tile
        in_range = col < hw
        tgt_mask = jnp.logical_and(tgt_mask, in_range)
        probs_all = probs * in_range.astype(jnp.float32)
    else:
        probs_all = probs

    # one-hot(target) already masked by (target != ignore_index) [and tail padding].
    onehot_m = jnp.logical_and(cls == t, tgt_mask).astype(jnp.float32)  # (C, TILE)

    # Per-class partial sums over the pixel (lane) axis.
    inter_ref[0] += jnp.sum(probs * onehot_m, axis=1, keepdims=True)    # dice numerator
    totalp_ref[0] += jnp.sum(probs_all, axis=1, keepdims=True)          # sum of probs (all real pixels)
    cnt_ref[0] += jnp.sum(onehot_m, axis=1, keepdims=True)              # one-hot sum == per-class pixel count
    cenum_ref[0] += jnp.sum(onehot_m * neglogp, axis=1, keepdims=True)  # per-class CE numerator


def _pick_tile(hw: int, max_tile: int, c: int) -> int:
    """Largest lane-aligned pixel tile <= max_tile; prefer one that divides hw."""
    # Keep one logits block modest in VMEM even for large class counts.
    budget = max(128, ((2 << 20) // max(c * 4, 1)) // 128 * 128)
    cap = max(128, min(max_tile, budget))
    best = 0
    t = 128
    while t <= cap:
        if hw % t == 0:
            best = t
        t += 128
    if best:
        return best
    # No lane-aligned divisor of hw: fall back and pad the pixel axis.
    return min(cap, 128 * pl.cdiv(hw, 128))


def cross_entropy_dice_loss(logits_nchw, targets_nhw, weight, *,
                            ignore_index: int = -1, eps: float = EPSILON,
                            alpha: float = 0.8, beta: float = 0.2,
                            max_tile: int = 2048):
    N, C, H, W = logits_nchw.shape
    HW = H * W

    tile = _pick_tile(HW, max_tile, C)
    HWp = tile * pl.cdiv(HW, tile)

    # NCHW -> (N, C, HW) is a free reshape (contiguous); no transpose pass in HBM.
    x = logits_nchw.reshape(N, C, HW).astype(jnp.float32)
    t = targets_nhw.reshape(N, 1, HW).astype(jnp.int32)
    if HWp != HW:
        x = jnp.pad(x, ((0, 0), (0, 0), (0, HWp - HW)))
        t = jnp.pad(t, ((0, 0), (0, 0), (0, HWp - HW)))

    grid = (N, HWp // tile)
    kernel = functools.partial(_ced_kernel, ignore_index=ignore_index,
                               hw=HW, tile=tile)

    out_sds = jax.ShapeDtypeStruct((N, C, 1), jnp.float32)
    acc_spec = pl.BlockSpec((1, C, 1), lambda n, j: (n, 0, 0))

    inter, total_p, cnt, cenum = pl.pallas_call(
        kernel,
        out_shape=(out_sds, out_sds, out_sds, out_sds),
        grid_spec=pltpu.PrefetchScalarGridSpec(
            num_scalar_prefetch=0,
            grid=grid,
            in_specs=[
                pl.BlockSpec((1, C, tile), lambda n, j: (n, 0, j)),
                pl.BlockSpec((1, 1, tile), lambda n, j: (n, 0, j)),
            ],
            out_specs=[acc_spec, acc_spec, acc_spec, acc_spec],
        ),
        compiler_params=pltpu.CompilerParams(
            dimension_semantics=("parallel", "arbitrary")),
    )(x, t)

    # Tiny per-class combine in JAX (C values per stat).
    wf = weight.astype(jnp.float32).reshape(C)
    inter = jnp.sum(inter[:, :, 0], axis=0)       # (C,)
    total_p = jnp.sum(total_p[:, :, 0], axis=0)   # (C,)
    cnt = jnp.sum(cnt[:, :, 0], axis=0)           # (C,)
    cenum = jnp.sum(cenum[:, :, 0], axis=0)       # (C,)

    # Dice loss.
    intersection = inter * wf
    total = (total_p + cnt) * wf
    dice = (2.0 * intersection + eps) / (total + eps)
    dice_loss = 1.0 - jnp.mean(dice)

    # Weighted mean CE (guard the degenerate all-ignored case against 0/0).
    ce_num = jnp.sum(wf * cenum)
    ce_den = jnp.sum(wf * cnt)
    ce_loss = jnp.where(ce_den > 0, ce_num / jnp.maximum(ce_den, 1e-30), 0.0)

    return alpha * ce_loss + beta * dice_loss


def _reference(logits, targets, weight, *, ignore_index=-1, eps=EPSILON,
               alpha=0.8, beta=0.2):
    N, C, H, W = logits.shape
    logits = logits.astype(jnp.float32)
    logp = jax.nn.log_softmax(logits, axis=1)
    probs = jnp.exp(logp)
    mask = (targets != ignore_index)
    maskf = mask.astype(jnp.float32)
    t_safe = jnp.where(mask, targets, 0)
    # weighted CE with ignore_index, reduction='mean'
    picked = jnp.take_along_axis(logp, t_safe[:, None], axis=1)[:, 0]
    w_t = weight[t_safe]
    ce = jnp.sum(maskf * w_t * (-picked)) / jnp.sum(maskf * w_t)
    # dice
    onehot = jnp.transpose(jax.nn.one_hot(t_safe, C), (0, 3, 1, 2)) * maskf[:, None]
    inter = jnp.sum(probs * onehot, axis=(0, 2, 3)) * weight
    total = (jnp.sum(probs, axis=(0, 2, 3)) + jnp.sum(onehot, axis=(0, 2, 3))) * weight
    dice = (2.0 * inter + eps) / (total + eps)
    return alpha * ce + beta * (1.0 - jnp.mean(dice))


if __name__ == "__main__":
    key = jax.random.PRNGKey(0)
    k1, k2, k3 = jax.random.split(key, 3)

    N, C, H, W = 2, 4, 16, 16
    logits = jax.random.normal(k1, (N, C, H, W), dtype=jnp.float32)
    targets = jax.random.randint(k2, (N, H, W), 0, C, dtype=jnp.int32)
    # sprinkle some ignore_index pixels
    ignore_mask = jax.random.uniform(k3, (N, H, W)) < 0.1
    targets = jnp.where(ignore_mask, -1, targets)
    # deterministic per-class weights
    weight = (0.5 + 0.5 * jnp.arange(C, dtype=jnp.float32))

    out = cross_entropy_dice_loss(logits, targets, weight)
    out = jax.block_until_ready(out)

    ref = _reference(logits, targets, weight)
    np.testing.assert_allclose(np.asarray(out), np.asarray(ref), rtol=1e-5, atol=1e-6)
    print("KERNEL_OK")
</pallas_src>

<mosaic_0001>
module attributes {stable_mosaic.version = 11 : i64} {
  func.func @_ced_kernel(%arg0: i32, %arg1: i32, %arg2: memref<1x4x256xf32, #tpu.memory_space<vmem>>, %arg3: memref<1x1x256xi32, #tpu.memory_space<vmem>>, %arg4: memref<1x4x1xf32, #tpu.memory_space<vmem>>, %arg5: memref<1x4x1xf32, #tpu.memory_space<vmem>>, %arg6: memref<1x4x1xf32, #tpu.memory_space<vmem>>, %arg7: memref<1x4x1xf32, #tpu.memory_space<vmem>>) attributes {dimension_semantics = [#tpu.dimension_semantics<parallel>, #tpu.dimension_semantics<arbitrary>], iteration_bounds = array<i64: 2, 1>, scalar_prefetch = 0 : i64, scratch_operands = 0 : i64, tpu.core_type = #tpu.core_type<tc>, window_params = [{transform_indices = @transform_0, window_bounds = array<i64: 1, 4, 256>}, {transform_indices = @transform_1, window_bounds = array<i64: 1, 1, 256>}, {transform_indices = @transform_2, window_bounds = array<i64: 1, 4, 1>}, {transform_indices = @transform_3, window_bounds = array<i64: 1, 4, 1>}, {transform_indices = @transform_4, window_bounds = array<i64: 1, 4, 1>}, {transform_indices = @transform_5, window_bounds = array<i64: 1, 4, 1>}]} {
    %c0_i32 = arith.constant 0 : i32
    %0 = arith.cmpi eq, %arg1, %c0_i32 : i32
    %1 = arith.extui %0 : i1 to i32
    %c0_i32_0 = arith.constant 0 : i32
    %2 = arith.cmpi ne, %1, %c0_i32_0 : i32
    scf.if %2 {
      %cst_35 = arith.constant 0.000000e+00 : f32
      %63 = vector.broadcast %cst_35 : f32 to vector<1x4x1xf32>
      %c0_36 = arith.constant 0 : index
      %c0_37 = arith.constant 0 : index
      %c0_38 = arith.constant 0 : index
      %64 = vector.load %arg4[%c0_36, %c0_37, %c0_38] : memref<1x4x1xf32, #tpu.memory_space<vmem>>, vector<1x4x1xf32>
      tpu.vector_store %arg4[%c0_36, %c0_37, %c0_38], %63 {strides = array<i32>} : memref<1x4x1xf32, #tpu.memory_space<vmem>>, vector<1x4x1xf32>,
      %cst_39 = arith.constant 0.000000e+00 : f32
      %65 = vector.broadcast %cst_39 : f32 to vector<1x4x1xf32>
      %c0_40 = arith.constant 0 : index
      %c0_41 = arith.constant 0 : index
      %c0_42 = arith.constant 0 : index
      %66 = vector.load %arg5[%c0_40, %c0_41, %c0_42] : memref<1x4x1xf32, #tpu.memory_space<vmem>>, vector<1x4x1xf32>
      tpu.vector_store %arg5[%c0_40, %c0_41, %c0_42], %65 {strides = array<i32>} : memref<1x4x1xf32, #tpu.memory_space<vmem>>, vector<1x4x1xf32>,
      %cst_43 = arith.constant 0.000000e+00 : f32
      %67 = vector.broadcast %cst_43 : f32 to vector<1x4x1xf32>
      %c0_44 = arith.constant 0 : index
      %c0_45 = arith.constant 0 : index
      %c0_46 = arith.constant 0 : index
      %68 = vector.load %arg6[%c0_44, %c0_45, %c0_46] : memref<1x4x1xf32, #tpu.memory_space<vmem>>, vector<1x4x1xf32>
      tpu.vector_store %arg6[%c0_44, %c0_45, %c0_46], %67 {strides = array<i32>} : memref<1x4x1xf32, #tpu.memory_space<vmem>>, vector<1x4x1xf32>,
      %cst_47 = arith.constant 0.000000e+00 : f32
      %69 = vector.broadcast %cst_47 : f32 to vector<1x4x1xf32>
      %c0_48 = arith.constant 0 : index
      %c0_49 = arith.constant 0 : index
      %c0_50 = arith.constant 0 : index
      %70 = vector.load %arg7[%c0_48, %c0_49, %c0_50] : memref<1x4x1xf32, #tpu.memory_space<vmem>>, vector<1x4x1xf32>
      tpu.vector_store %arg7[%c0_48, %c0_49, %c0_50], %69 {strides = array<i32>} : memref<1x4x1xf32, #tpu.memory_space<vmem>>, vector<1x4x1xf32>,
    } else {
    }
    %c0 = arith.constant 0 : index
    %c0_1 = arith.constant 0 : index
    %c0_2 = arith.constant 0 : index
    %3 = vector.load %arg2[%c0, %c0_1, %c0_2] : memref<1x4x256xf32, #tpu.memory_space<vmem>>, vector<1x4x256xf32>
    %4 = vector.shape_cast %3 : vector<1x4x256xf32> to vector<4x256xf32>
    %c0_3 = arith.constant 0 : index
    %c0_4 = arith.constant 0 : index
    %c0_5 = arith.constant 0 : index
    %5 = vector.load %arg3[%c0_3, %c0_4, %c0_5] : memref<1x1x256xi32, #tpu.memory_space<vmem>>, vector<1x1x256xi32>
    %6 = vector.shape_cast %5 : vector<1x1x256xi32> to vector<1x256xi32>
    %cst = arith.constant dense<0xFF800000> : vector<256xf32>
    %7 = vector.multi_reduction <maximumf>, %4, %cst [0] : vector<4x256xf32> to vector<256xf32>
    %8 = vector.shape_cast %7 : vector<256xf32> to vector<1x256xf32>
    %9 = vector.broadcast %8 : vector<1x256xf32> to vector<4x256xf32>
    %10 = arith.subf %4, %9 : vector<4x256xf32>
    %11 = math.exp %10 : vector<4x256xf32>
    %cst_6 = arith.constant dense<0.000000e+00> : vector<256xf32>
    %12 = vector.multi_reduction <add>, %11, %cst_6 [0] : vector<4x256xf32> to vector<256xf32>
    %13 = vector.shape_cast %12 : vector<256xf32> to vector<1x256xf32>
    %14 = vector.broadcast %13 : vector<1x256xf32> to vector<4x256xf32>
    %15 = arith.divf %11, %14 : vector<4x256xf32>
    %16 = math.log %13 : vector<1x256xf32>
    %17 = arith.addf %8, %16 : vector<1x256xf32>
    %18 = vector.broadcast %17 : vector<1x256xf32> to vector<4x256xf32>
    %19 = arith.subf %18, %4 : vector<4x256xf32>
    %20 = tpu.iota {dimensions = array<i32: 0>} : vector<4x256xi32>
    %c-1_i32 = arith.constant -1 : i32
    %21 = vector.broadcast %c-1_i32 : i32 to vector<1x256xi32>
    %22 = arith.cmpi ne, %6, %21 : vector<1x256xi32>
    %23 = vector.broadcast %6 : vector<1x256xi32> to vector<4x256xi32>
    %24 = arith.cmpi eq, %20, %23 : vector<4x256xi32>
    %25 = vector.broadcast %22 : vector<1x256xi1> to vector<4x256xi1>
    %26 = arith.andi %24, %25 : vector<4x256xi1>
    %27 = arith.extui %26 : vector<4x256xi1> to vector<4x256xi32>
    %28 = arith.sitofp %27 : vector<4x256xi32> to vector<4x256xf32>
    %c0_7 = arith.constant 0 : index
    %c0_8 = arith.constant 0 : index
    %c0_9 = arith.constant 0 : index
    %29 = vector.load %arg4[%c0_7, %c0_8, %c0_9] : memref<1x4x1xf32, #tpu.memory_space<vmem>>, vector<1x4x1xf32>
    %30 = vector.shape_cast %29 : vector<1x4x1xf32> to vector<4x1xf32>
    %31 = arith.mulf %15, %28 : vector<4x256xf32>
    %cst_10 = arith.constant dense<0.000000e+00> : vector<4xf32>
    %32 = vector.multi_reduction <add>, %31, %cst_10 [1] : vector<4x256xf32> to vector<4xf32>
    %33 = vector.shape_cast %32 : vector<4xf32> to vector<4x1xf32>
    %34 = arith.addf %30, %33 : vector<4x1xf32>
    %c0_11 = arith.constant 0 : index
    %c0_12 = arith.constant 0 : index
    %c0_13 = arith.constant 0 : index
    %35 = vector.load %arg4[%c0_11, %c0_12, %c0_13] : memref<1x4x1xf32, #tpu.memory_space<vmem>>, vector<1x4x1xf32>
    %36 = vector.shape_cast %35 : vector<1x4x1xf32> to vector<4x1xf32>
    %37 = vector.shape_cast %34 : vector<4x1xf32> to vector<1x4x1xf32>
    tpu.vector_store %arg4[%c0_11, %c0_12, %c0_13], %37 {strides = array<i32>} : memref<1x4x1xf32, #tpu.memory_space<vmem>>, vector<1x4x1xf32>,
    %c0_14 = arith.constant 0 : index
    %c0_15 = arith.constant 0 : index
    %c0_16 = arith.constant 0 : index
    %38 = vector.load %arg5[%c0_14, %c0_15, %c0_16] : memref<1x4x1xf32, #tpu.memory_space<vmem>>, vector<1x4x1xf32>
    %39 = vector.shape_cast %38 : vector<1x4x1xf32> to vector<4x1xf32>
    %cst_17 = arith.constant dense<0.000000e+00> : vector<4xf32>
    %40 = vector.multi_reduction <add>, %15, %cst_17 [1] : vector<4x256xf32> to vector<4xf32>
    %41 = vector.shape_cast %40 : vector<4xf32> to vector<4x1xf32>
    %42 = arith.addf %39, %41 : vector<4x1xf32>
    %c0_18 = arith.constant 0 : index
    %c0_19 = arith.constant 0 : index
    %c0_20 = arith.constant 0 : index
    %43 = vector.load %arg5[%c0_18, %c0_19, %c0_20] : memref<1x4x1xf32, #tpu.memory_space<vmem>>, vector<1x4x1xf32>
    %44 = vector.shape_cast %43 : vector<1x4x1xf32> to vector<4x1xf32>
    %45 = vector.shape_cast %42 : vector<4x1xf32> to vector<1x4x1xf32>
    tpu.vector_store %arg5[%c0_18, %c0_19, %c0_20], %45 {strides = array<i32>} : memref<1x4x1xf32, #tpu.memory_space<vmem>>, vector<1x4x1xf32>,
    %c0_21 = arith.constant 0 : index
    %c0_22 = arith.constant 0 : index
    %c0_23 = arith.constant 0 : index
    %46 = vector.load %arg6[%c0_21, %c0_22, %c0_23] : memref<1x4x1xf32, #tpu.memory_space<vmem>>, vector<1x4x1xf32>
    %47 = vector.shape_cast %46 : vector<1x4x1xf32> to vector<4x1xf32>
    %cst_24 = arith.constant dense<0.000000e+00> : vector<4xf32>
    %48 = vector.multi_reduction <add>, %28, %cst_24 [1] : vector<4x256xf32> to vector<4xf32>
    %49 = vector.shape_cast %48 : vector<4xf32> to vector<4x1xf32>
    %50 = arith.addf %47, %49 : vector<4x1xf32>
    %c0_25 = arith.constant 0 : index
    %c0_26 = arith.constant 0 : index
    %c0_27 = arith.constant 0 : index
    %51 = vector.load %arg6[%c0_25, %c0_26, %c0_27] : memref<1x4x1xf32, #tpu.memory_space<vmem>>, vector<1x4x1xf32>
    %52 = vector.shape_cast %51 : vector<1x4x1xf32> to vector<4x1xf32>
    %53 = vector.shape_cast %50 : vector<4x1xf32> to vector<1x4x1xf32>
    tpu.vector_store %arg6[%c0_25, %c0_26, %c0_27], %53 {strides = array<i32>} : memref<1x4x1xf32, #tpu.memory_space<vmem>>, vector<1x4x1xf32>,
    %c0_28 = arith.constant 0 : index
    %c0_29 = arith.constant 0 : index
    %c0_30 = arith.constant 0 : index
    %54 = vector.load %arg7[%c0_28, %c0_29, %c0_30] : memref<1x4x1xf32, #tpu.memory_space<vmem>>, vector<1x4x1xf32>
    %55 = vector.shape_cast %54 : vector<1x4x1xf32> to vector<4x1xf32>
    %56 = arith.mulf %28, %19 : vector<4x256xf32>
    %cst_31 = arith.constant dense<0.000000e+00> : vector<4xf32>
    %57 = vector.multi_reduction <add>, %56, %cst_31 [1] : vector<4x256xf32> to vector<4xf32>
    %58 = vector.shape_cast %57 : vector<4xf32> to vector<4x1xf32>
    %59 = arith.addf %55, %58 : vector<4x1xf32>
    %c0_32 = arith.constant 0 : index
    %c0_33 = arith.constant 0 : index
    %c0_34 = arith.constant 0 : index
    %60 = vector.load %arg7[%c0_32, %c0_33, %c0_34] : memref<1x4x1xf32, #tpu.memory_space<vmem>>, vector<1x4x1xf32>
    %61 = vector.shape_cast %60 : vector<1x4x1xf32> to vector<4x1xf32>
    %62 = vector.shape_cast %59 : vector<4x1xf32> to vector<1x4x1xf32>
    tpu.vector_store %arg7[%c0_32, %c0_33, %c0_34], %62 {strides = array<i32>} : memref<1x4x1xf32, #tpu.memory_space<vmem>>, vector<1x4x1xf32>,
    return
  }
  func.func @transform_0(%arg0: i32, %arg1: i32) -> (i32, i32, i32) {
    %c0_i32 = arith.constant 0 : i32
    %c0_i32_0 = arith.constant 0 : i32
    return %arg0, %c0_i32, %arg1 : i32, i32, i32
  }
  func.func @transform_1(%arg0: i32, %arg1: i32) -> (i32, i32, i32) {
    %c0_i32 = arith.constant 0 : i32
    %c0_i32_0 = arith.constant 0 : i32
    return %arg0, %c0_i32, %arg1 : i32, i32, i32
  }
  func.func @transform_2(%arg0: i32, %arg1: i32) -> (i32, i32, i32) {
    %c0_i32 = arith.constant 0 : i32
    %c0_i32_0 = arith.constant 0 : i32
    %c0_i32_1 = arith.constant 0 : i32
    return %arg0, %c0_i32, %c0_i32_0 : i32, i32, i32
  }
  func.func @transform_3(%arg0: i32, %arg1: i32) -> (i32, i32, i32) {
    %c0_i32 = arith.constant 0 : i32
    %c0_i32_0 = arith.constant 0 : i32
    %c0_i32_1 = arith.constant 0 : i32
    return %arg0, %c0_i32, %c0_i32_0 : i32, i32, i32
  }
  func.func @transform_4(%arg0: i32, %arg1: i32) -> (i32, i32, i32) {
    %c0_i32 = arith.constant 0 : i32
    %c0_i32_0 = arith.constant 0 : i32
    %c0_i32_1 = arith.constant 0 : i32
    return %arg0, %c0_i32, %c0_i32_0 : i32, i32, i32
  }
  func.func @transform_5(%arg0: i32, %arg1: i32) -> (i32, i32, i32) {
    %c0_i32 = arith.constant 0 : i32
    %c0_i32_0 = arith.constant 0 : i32
    %c0_i32_1 = arith.constant 0 : i32
    return %arg0, %c0_i32, %c0_i32_0 : i32, i32, i32
  }
}

</mosaic_0001>

<bundles_post_ra>
// kernel: tpu_custom_call.1
= control target key start
LH: loop header
LB: loop body
LE: loop exit
PB: predicated region body
PF: predicated region fallthrough
CT: control target
= control target key end

     0   :  { %11 = vsyncpa [#allocation3], 0  ;;  %s1109_s0 = inlined_call_operand.hbm [shape: f32[2,4,256], index: 0, kind: input, shape index: {}]   ;;  %s1110_s1 = inlined_call_operand.hbm [shape: s32[2,1,256], index: 1, kind: input, shape index: {}]   ;;  %s1111_s2 = inlined_call_operand.vmem [shape: f32[2,4,1], index: 2, kind: output, shape index: {0}]   ;;  %s1112_s3 = inlined_call_operand.vmem [shape: f32[2,4,1], index: 3, kind: output, shape index: {1}]   ;;  %s1113_s4 = inlined_call_operand.vmem [shape: f32[2,4,1], index: 4, kind: output, shape index: {2}]   ;;  %s1114_s5 = inlined_call_operand.vmem [shape: f32[2,4,1], index: 5, kind: output, shape index: {3}]  }
   0x1   :  { %13 = vsyncpa [#allocation3 + $0x1], 0 }
   0x2   :  { %14 = vsyncpa [#allocation5], 0 }
   0x3   :  { %16 = vsyncpa [#allocation5 + $0x1], 0  ;;  %s932_s18 = smov 0   ;;  %s934_s19 = smov 0  }
   0x4   :  { %s936_s20 = smov 0   ;;  %s938_s21 = smov 0  }
   0x5   :  { %s940_s22 = smov 0   ;;  %s942_s23 = smov 0  }
   0x6 LB: > { %s693_s24 = sadd.s32 4294967295, %s898_s23   ;;  %s34_s25 = sadd.s32 1, %s894_s22  ;;  %s898_s23 = sphi %s942_s23, %s22_s23   ;;  %s894_s22 = sphi %s940_s22, %s1122_s22   ;;  %s890_s21 = sphi %s938_s21, %s1121_s21   ;;  %s886_s20 = sphi %s936_s20, %s1120_s20   ;;  %s882_s19 = sphi %s934_s19, %s1119_s19   ;;  %s878_s18 = sphi %s932_s18, %s1118_s18  }
   0x7   : > { %p36_p0 = scmp.ge.s32.totalorder %s34_s25, 2  ;;  %s43_s26 = sadd.s32 1, %s886_s20 }
   0x8   : > { %p50_p1 = scmp.ne.s32.totalorder %s886_s20, %s882_s19  ;;  %p51_p2 = scmp.eq.s32.totalorder %s898_s23, 0 }
   0x9   : > { %s1124_s25 = smov (%p36_p0, %s34_s25), 0  ;;  %p56_p4 = scmp.ne.s32.totalorder %s882_s19, %s878_s18 }
   0xa   : > { %p968_p3 = por %p51_p2, %p50_p1  ;;  %s38_s28 = ssub.s32 %s894_s22, %s1124_s25 }
   0xb   : > { %p57_p5 = scmp.eq.s32.totalorder %s693_s24, 0  ;;  %p41_p6 = scmp.eq.s32.totalorder %s38_s28, 0 }
   0xc   : > { %p725_p8 = scmp.lt.s32.totalorder %s898_s23, 2  ;;  %s212_s6 = sand.u32 1, %s886_s20  }
   0xd   : > { %p975_p7 = por %p57_p5, %p56_p4  ;;  %s713_s7 = sshll.u32 %s894_s22, 3 }
   0xe   : > { %s981_s30 = scalar_select %p41_p6, %s886_s20, %s43_s26  }
   0xf   : > { %s697_s8 = sshll.u32 %s212_s6, 3  ;;  %s223_s11 = scalar_lea.hbm %s1109_s0, %s713_s7 }
  0x10   : > { %s225_s12 = sshll.u32 %s223_s11, 4  ;;  %s216_s13 = scalar_lea.vmem [#allocation2], %s697_s8  ;;  %s226_s12 = int_to_ptr.hbm [resolvable:$true] %s225_s12 }
  0x11   : > { %s227_s14 = sshll.u32 %s216_s13, 4  ;;  %p990_p9 = pnand %p725_p8, %p968_p3  ;;  %s228_s14 = int_to_ptr.vmem [resolvable:$true] %s227_s14 }
  0x12   : > { %p702_p10 = scmp.ge.s32.totalorder %s898_s23, 1  ;;  %p253_p11 = scmp.lt.s32.totalorder %s898_s23, 3 }
  0x13   : > { %s700_s16 = sshll.u32 %s212_s6, 1  ;;  %s213_s17 = scalar_lea.sflag [#allocation3], %s212_s6 }
  0x14   : > { %721 = dma.hbm_to_vmem [thread:$0]  (!%p990_p9), %s226_s12, 128, %s228_s14, %s213_s17  }
  0x15   : > { %p254_p12 = pnand %p702_p10, %p253_p11  ;;  %s701_s18 = sshll.u32 %s894_s22, 1 }
  0x16   : > { %s238_s24 = scalar_lea.vmem [#allocation4], %s700_s16  ;;  %s244_s27 = scalar_lea.hbm %s1110_s1, %s701_s18 }
  0x17   : > { %s248_s26 = sshll.u32 %s238_s24, 4  ;;  %s246_s8 = sshll.u32 %s244_s27, 4  ;;  %s249_s26 = int_to_ptr.vmem [resolvable:$true] %s248_s26  ;;  %s247_s8 = int_to_ptr.hbm [resolvable:$true] %s246_s8 }
  0x18   : > { %s235_s9 = scalar_lea.sflag [#allocation5], %s212_s6  ;;  %257 = sbr.rel (%p254_p12) target bundleno = 253 (0xfd), region = 28 }
  0x19   : > { %724 = dma.hbm_to_vmem [thread:$0]  (!%p990_p9), %s247_s8, 32, %s249_s26, %s235_s9  }
  0x1a   : > { %s259_s10 = sand.u32 (!%p254_p12), 1, %s882_s19  }
  0x1b   : > { %s703_s11 = sshll.u32 (!%p254_p12), %s259_s10, 3  ;;  %s260_s12 = scalar_lea.sflag (!%p254_p12), [#allocation3], %s259_s10 }
  0x1c   : > { %s263_s13 = scalar_lea.vmem (!%p254_p12), [#allocation2], %s703_s11 }
  0x1d   : > { %869 = dma.done.wait (%p975_p7), %s260_s12, 128  }
  0x1e   : > { %871 = vsyncadd (%p975_p7), %s260_s12, 4294967168  ;;  %s704_s14 = sshll.u32 %s259_s10, 1  ;;  %s270_s16 = scalar_lea.sflag [#allocation5], %s259_s10 }
  0x1f   : > { %s273_s17 = scalar_lea.vmem [#allocation4], %s704_s14 }
  0x20   : > { %873 = dma.done.wait (%p975_p7), %s270_s16, 32  }
  0x21   : > { %875 = vsyncadd (%p975_p7), %s270_s16, 4294967264  ;;  %v428_v0 = vlaneseq  ;;  %v345_v1 = vld [vmem:[%s273_s17] sm:$0x3]  ;;  %v344_v3 = vld [vmem:[%s263_s13] sm:$0xff]  ;;  %v900_v6 = vmov 0   ;;  %vm352_vm6 = vcmask 1043456  }
  0x22   : > { %vm430_vm0 = vcmp.ne.s32.totalorder %v345_v1, 4294967295  ;;  %v431_v4 = vperm.slane %v345_v1, 0  ;;  %v432_v5 = vperm.slane %v345_v1, 1  ;;  %347 = vst [vmem:[#allocation1] ss:$2 sm:$0xff] %v344_v3  ;;  %v901_v10 = vmov 0.0  }
  0x23   : > { %v429_v2 = vshrl.u32 %v428_v0, 7  ;;  %v435_v7 = vsel %vm430_vm0, 1, %v900_v6  ;;  %p319_p13 = scmp.lt.s32.totalorder %s890_s21, 1  ;;  %vm339_vm9 = vcmask 3072  }
  0x24   : > { %v436_v8 = vperm.slane %v435_v7, 0  ;;  %v437_v9 = vperm.slane %v435_v7, 1 }
  0x25   : > { %vm433_vm1 = vcmp.eq.s32.totalorder %v429_v2, %v431_v4  ;;  %vm434_vm2 = vcmp.eq.s32.totalorder %v429_v2, %v432_v5  ;;  %s1126_s21 = smov (!%p319_p13, %s890_s21), 1 }
  0x26   : > { %vm438_vm3 = vcmp.eq.s32.totalorder %v436_v8, 1  ;;  %vm439_vm4 = vcmp.eq.s32.totalorder %v437_v9, 1  ;;  %s1037_s29 = sshll.u32 %s1126_s21, 2 }
  0x27   : > { %vm440_vm5 = vmand %vm433_vm1, %vm438_vm3  ;;  %s1043_s18 = scalar_lea.vmem %s1113_s4, %s1037_s29  ;;  %s1049_s21 = scalar_lea.vmem %s1111_s2, %s1037_s29 }
  0x28   : > { %vm441_vm7 = vmand %vm434_vm2, %vm439_vm4  ;;  %v1014_v11 = vsel %vm440_vm5, 1.0, %v901_v10  ;;  %342 = vst.msk [vmem:[%s1043_s18] sm:$0xf] %vm339_vm9, %v901_v10  ;;  %s334_s27 = scalar_lea.vmem %s1114_s5, %s1037_s29  ;;  %s1070_s10 = scalar_lea.vmem %s1112_s3, %s1037_s29 }
  0x29   : > { %v1017_v12 = vsel %vm441_vm7, 1.0, %v901_v10  ;;  %v482_v13 = vsel %vm352_vm6, %v1014_v11, 0.0  ;;  %v348_v14 = vld.sshfl [vmem:[#allocation1] sm:$0xff pattern:$0x75316420] }
  0x2a   : > { %v483_v15 = vsel %vm352_vm6, %v1017_v12, 0.0  ;;  %v349_v16 = vld.sshfl [vmem:[#allocation1 + $0x8] sm:$0xff pattern:$0x75316420]  ;;  %v353_v17 = vsel %vm352_vm6, %v348_v14, -inf  ;;  %v449_v37 = vrot.slane %v1017_v12, 4 }
  0x2b   : > { %v484_v18 = vadd.f32 %v483_v15, %v482_v13  ;;  %v354_v19 = vrot.slane %v353_v17, 4  ;;  %v360_v20 = vsel %vm352_vm6, %v349_v16, -inf  ;;  %340 = vst.msk [vmem:[%s1049_s21] sm:$0xf] %vm339_vm9, %v901_v10 }
  0x2c   : > { %v361_v21 = vrot.slane %v360_v20, 4  ;;  %v450_v44 = vsel %vm352_vm6, %v1014_v11, %v449_v37  ;;  %343 = vst.msk [vmem:[%s334_s27] sm:$0xf] %vm339_vm9, %v901_v10 }
  0x2d   : > { %485 = vadd.xlane.f32.xlu1 %v484_v18  ;;  %v355_v22 = vmax.f32 %v353_v17, %v354_v19  ;;  %341 = vst.msk [vmem:[%s1070_s10] sm:$0xf] %vm339_vm9, %v901_v10 }
  0x2e   : > { %v362_v23 = vmax.f32 %v360_v20, %v361_v21 }
  0x2f   : > { %v356_v24 = vrot.slane %v355_v22, 2 }
  0x30   : > { %v363_v25 = vrot.slane %v362_v23, 2 }
  0x31   : > { %v357_v26 = vmax.f32 %v355_v22, %v356_v24 }
  0x32   : > { %v364_v27 = vmax.f32 %v362_v23, %v363_v25 }
  0x33   : > { %v358_v28 = vrot.slane %v357_v26, 1 }
  0x34   : > { %v365_v29 = vrot.slane %v364_v27, 1 }
  0x35   : > { %v359_v30 = vmax.f32 %v357_v26, %v358_v28 }
  0x36   : > { %v366_v31 = vmax.f32 %v364_v27, %v365_v29 }
  0x38   : > { %v369_v32 = vrot.slane %v366_v31, 4 }
  0x3a   : > { %v370_v33 = vsel %vm352_vm6, %v359_v30, %v369_v32 }
  0x3b   : > { %v372_v34 = vsub.f32 %v344_v3, %v370_v33  ;;  %v489_v33 = vld [vmem:[%s334_s27] sm:$0xf] }
  0x3d   : > { %v373_v35 = vmul.f32 1.442695, %v372_v34 }
  0x3f   : > { %776 = vpow2.f32 %v373_v35 }
  0x45   : > { %v1026_v36 = vpop.eup %776 }
  0x46   : > { %376 = vst [vmem:[#allocation1] ss:$2 sm:$0xff] %v1026_v36 }
  0x4d   : > { %v377_v38 = vld.sshfl [vmem:[#allocation1] sm:$0xff pattern:$0x75316420]  ;;  %v378_v39 = vld.sshfl [vmem:[#allocation1 + $0x8] sm:$0xff pattern:$0x75316420] }
  0x4e   : > { %v381_v40 = vsel %vm352_vm6, %v377_v38, 0.0  ;;  %v388_v41 = vsel %vm352_vm6, %v378_v39, 0.0  ;;  %421 = vst [vmem:[#allocation1] ss:$2 sm:$0xff] %v344_v3  ;;  %v467_v39 = vld [vmem:[%s1070_s10] sm:$0xf] }
  0x4f   : > { %v382_v42 = vrot.slane %v381_v40, 4  ;;  %v389_v43 = vrot.slane %v388_v41, 4 }
  0x51   : > { %v383_v45 = vadd.f32 %v382_v42, %v381_v40  ;;  %v390_v46 = vadd.f32 %v389_v43, %v388_v41 }
  0x53   : > { %v384_v47 = vrot.slane %v383_v45, 2  ;;  %v391_v48 = vrot.slane %v390_v46, 2 }
  0x55   : > { %v385_v49 = vadd.f32 %v384_v47, %v383_v45  ;;  %v392_v50 = vadd.f32 %v391_v48, %v390_v46  ;;  %v422_v0 = vld.sshfl [vmem:[#allocation1] sm:$0xff pattern:$0x75316420]  ;;  %v423_v3 = vld.sshfl [vmem:[#allocation1 + $0x8] sm:$0xff pattern:$0x75316420] }
  0x57   : > { %v386_v51 = vrot.slane %v385_v49, 1  ;;  %v393_v52 = vrot.slane %v392_v50, 1 }
  0x59   : > { %v387_v53 = vadd.f32 %v386_v51, %v385_v49  ;;  %v394_v54 = vadd.f32 %v393_v52, %v392_v50 }
  0x5b   : > { %v397_v55 = vrot.slane %v394_v54, 4  ;;  %778 = vlog2.f32 %v387_v53 }
  0x5c   : > { %780 = vlog2.f32 %v394_v54 }
  0x5d   : > { %v398_v56 = vsel %vm352_vm6, %v387_v53, %v397_v55 }
  0x5e   : > { %782 = vrcp.f32 %v398_v56  ;;  %vm405_vm8 = vweird.f32 %v398_v56  ;;  %v411_v2 = vand.u32 2147483648, %v398_v56  ;;  %v409_v6 = vand.u32 2147483647, %v398_v56 }
  0x60   : > { %v412_v14 = vor.u32 1.1754944e-38, %v411_v2  ;;  %vm410_vm12 = vcmp.eq.f32.partialorder %v409_v6, 8.507059e+37 }
  0x61   : > { %v779_v57 = vpop.eup %778 }
  0x62   : > { %v781_v58 = vpop.eup %780  ;;  %v416_v59 = vmul.f32 0.6931472, %v779_v57 }
  0x63   : > { %v418_v60 = vmul.f32 0.6931472, %v781_v58 }
  0x64   : > { %v783_v61 = vpop.eup %782  ;;  %v419_v62 = vadd.f32 %v416_v59, %v359_v30  ;;  %v481_v30 = vld [vmem:[%s1043_s18] sm:$0xf] }
  0x65   : > { %v401_v63 = vmul.f32 %v783_v61, %v398_v56  ;;  %v420_v1 = vadd.f32 %v418_v60, %v366_v31  ;;  %vm406_vm10 = vweird.f32 %v783_v61 }
  0x66   : > { %v426_v4 = vsub.f32 %v419_v62, %v422_v0  ;;  %vm407_vm11 = vmor %vm405_vm8, %vm406_vm10 }
  0x67   : > { %v402_v5 = vsub.f32 1.0, %v401_v63  ;;  %v427_v7 = vsub.f32 %v420_v1, %v423_v3 }
  0x68   : > { %v490_v8 = vmul.f32 %v1014_v11, %v426_v4 }
  0x69   : > { %v403_v9 = vmul.f32 %v783_v61, %v402_v5  ;;  %v491_v13 = vmul.f32 %v1017_v12, %v427_v7 }
  0x6a   : > { %v492_v15 = vsel %vm352_vm6, %v490_v8, 0.0 }
  0x6b   : > { %v404_v16 = vadd.f32 %v783_v61, %v403_v9  ;;  %v493_v17 = vsel %vm352_vm6, %v491_v13, 0.0 }
  0x6c   : > { %v494_v18 = vadd.f32 %v493_v17, %v492_v15 }
  0x6d   : > { %v408_v19 = vsel %vm407_vm11, %v783_v61, %v404_v16 }
  0x6e   : > { %v413_v20 = vsel %vm410_vm12, %v412_v14, %v408_v19  ;;  %495 = vadd.xlane.f32.xlu1 %v494_v18 }
  0x6f   : > { %v414_v11 = vmul.f32 %v1026_v36, %v413_v20  ;;  %v446_v36 = vld [vmem:[%s1049_s21] sm:$0xf] }
  0x71   : > { %v452_v21 = vmul.f32 %v450_v44, %v414_v11 }
  0x73   : > { %454 = vst [vmem:[#allocation1] ss:$2 sm:$0xff] %v452_v21 }
  0x7a   : > { %v455_v12 = vld.sshfl [vmem:[#allocation1] sm:$0xff pattern:$0x75316420]  ;;  %v456_v22 = vld.sshfl [vmem:[#allocation1 + $0x8] sm:$0xff pattern:$0x75316420] }
  0x7b   : > { %v459_v23 = vsel %vm352_vm6, %v455_v12, 0.0  ;;  %v460_v24 = vsel %vm352_vm6, %v456_v22, 0.0  ;;  %469 = vst [vmem:[#allocation1] ss:$2 sm:$0xff] %v414_v11 }
  0x7c   : > { %v461_v25 = vadd.f32 %v460_v24, %v459_v23 }
  0x7e   : > { %462 = vadd.xlane.f32.xlu0 %v461_v25 }
  0x82   : > { %v470_v26 = vld.sshfl [vmem:[#allocation1] sm:$0xff pattern:$0x75316420]  ;;  %v471_v27 = vld.sshfl [vmem:[#allocation1 + $0x8] sm:$0xff pattern:$0x75316420] }
  0x83   : > { %v474_v28 = vsel %vm352_vm6, %v470_v26, 0.0  ;;  %v475_v29 = vsel %vm352_vm6, %v471_v27, 0.0 }
  0x84   : > { %v476_v10 = vadd.f32 %v475_v29, %v474_v28 }
  0x86   : > { %477 = vadd.xlane.f32.xlu0 %v476_v10 }
  0xa0   : > { %v486_v31 = vpop.xlane.xlu1 %485 }
  0xa1   : > { %v487_v32 = vadd.f32 %v486_v31, %v481_v30 }
  0xa3   : > { %488 = vst.msk [vmem:[%s1043_s18] sm:$0xf] %vm339_vm9, %v487_v32 }
  0xe1   : > { %v496_v34 = vpop.xlane.xlu1 %495 }
  0xe2   : > { %v497_v35 = vadd.f32 %v496_v34, %v489_v33 }
  0xe4   : > { %498 = vst.msk [vmem:[%s334_s27] sm:$0xf] %vm339_vm9, %v497_v35 }
  0xf1   : > { %v463_v37 = vpop.xlane.xlu0 %462 }
  0xf2   : > { %v464_v38 = vadd.f32 %v463_v37, %v446_v36 }
  0xf4   : > { %466 = vst.msk [vmem:[%s1049_s21] sm:$0xf] %vm339_vm9, %v464_v38 }
  0xf9   : > { %v478_v40 = vpop.xlane.xlu0 %477 }
  0xfa   : > { %v479_v41 = vadd.f32 %v478_v40, %v467_v39 }
  0xfc   : > { %480 = vst.msk [vmem:[%s1070_s10] sm:$0xf] %vm339_vm9, %v479_v41 }
  0xfd PF: > { %s22_s23 = sadd.s32 1, %s898_s23   ;;  %s1118_s18 = smov %s882_s19 }
  0xfe   : > { %p19_p0 = scmp.ge.s32.totalorder %s22_s23, 4   ;;  %s1119_s19 = smov %s886_s20 }
  0xff   : > { %s1120_s20 = smov %s981_s30  ;;  %s1121_s21 = smov %s894_s22 }
 0x100   : > { %s1122_s22 = smov %s1124_s25  ;;  %21 = sbr.rel (!%p19_p0) target bundleno = 6 (0x6), region = 121 }
 0x105   :  { %560 = vsyncpa [#allocation3], 1 }
 0x106   :  { %562 = vsyncpa [#allocation3 + $0x1], 1 }
 0x107   :  { %563 = vsyncpa [#allocation5], 1 }
 0x108   :  { %565 = vsyncpa [#allocation5 + $0x1], 1 }

</bundles_post_ra>
